<compile_context>
chip_gen: v6e
topology: v6e:2x2x1
jax: 0.10.0
libtpu: 0.0.40
codegen_flags: <defaults>
</compile_context>

<pallas_src>
import functools
import math

import jax
import jax.numpy as jnp
import numpy as np
from jax.experimental import pallas as pl
from jax.experimental.pallas import tpu as pltpu


# ----------------------------- fused Pallas kernel -----------------------------

def _bottleneck_kernel(x_ref, w1_ref, b1_ref, w2_ref, b2_ref, w3_ref, b3_ref,
                       o_ref, *, H, W):
    """Whole bottleneck for one (Cin, BT*H*W) channels-first slab.

    Channels live on sublanes, (batch_tile * H * W) is flattened on lanes.
    conv2's 3x3 taps are lane-rolled views of h1 with hoisted edge masks and
    per-tap accumulating matmuls (no im2col scratch).
    """
    f32 = jnp.float32
    cdt = w1_ref.dtype                                   # compute dtype

    x = x_ref[...]                                       # (Cin, L)
    lanes = x.shape[1]

    # ---- conv1 (1x1) + BN1 + ReLU --------------------------------------
    h1 = jnp.dot(w1_ref[...], x, preferred_element_type=f32)
    h1 = jnp.maximum(h1 + b1_ref[...], 0.0)
    h1c = h1.astype(cdt)                                 # (Cpad, L)

    # ---- hoisted edge masks for the 3x3 taps ----------------------------
    col = jax.lax.broadcasted_iota(jnp.int32, (1, lanes), 1)
    if W & (W - 1) == 0:
        xcol = jnp.bitwise_and(col, W - 1)
        row = jnp.right_shift(col, int(math.log2(W)))
    else:
        xcol = col % W
        row = col // W
    yrow = jnp.bitwise_and(row, H - 1) if H & (H - 1) == 0 else row % H

    x_masks = (xcol >= 1, None, xcol <= W - 2)           # dx = -1, 0, +1
    y_masks = (yrow >= 1, None, yrow <= H - 2)           # dy = -1, 0, +1

    # ---- conv2 (3x3, pad=1) + BN2 + ReLU: 9 accumulating per-tap matmuls
    acc = None
    for ky in range(3):
        for kx in range(3):
            s = (ky - 1) * W + (kx - 1)                  # static flat shift
            piece = h1c if s == 0 else pltpu.roll(h1c, shift=(-s) % lanes, axis=1)
            m = y_masks[ky]
            if x_masks[kx] is not None:
                m = x_masks[kx] if m is None else jnp.logical_and(m, x_masks[kx])
            if m is not None:
                piece = jnp.where(m, piece, jnp.zeros_like(piece))
            tap = jnp.dot(w2_ref[ky * 3 + kx], piece, preferred_element_type=f32)
            acc = tap if acc is None else acc + tap
    h2 = jnp.maximum(acc + b2_ref[...], 0.0)
    h2c = h2.astype(cdt)

    # ---- conv3 (1x1) + BN3 + residual + ReLU -----------------------------
    h3 = jnp.dot(w3_ref[...], h2c, preferred_element_type=f32)
    h3 = h3 + b3_ref[...] + x.astype(f32)                # Cexp == Cin
    o_ref[...] = jnp.maximum(h3, 0.0).astype(o_ref.dtype)


# ----------------------------- wrapper -----------------------------

def _pick_batch_tile(n, hw, target_lanes=512):
    """Largest divisor of n whose tile*hw is ~target_lanes (>= hw)."""
    bt = max(1, min(n, target_lanes // hw if hw else n))
    while n % bt:
        bt -= 1
    return bt


def bottleneck_forward(x_nchw, p, *, eps=1e-5, compute_dtype=jnp.bfloat16):
    N, Cin, H, W = x_nchw.shape
    HW = H * W
    C = p["conv1_w"].shape[0]
    Cexp = p["conv3_w"].shape[0]
    assert Cin == Cexp, "stride=1 / no-downsample path requires Cin == Cexp"

    f32 = jnp.float32
    sub = 16 if compute_dtype == jnp.bfloat16 else 8
    Cpad = ((C + sub - 1) // sub) * sub                  # sublane-aligned pad

    def fold(w2d, cb, g, be, m, v):                      # fold inference BN
        s = g / jnp.sqrt(v + eps)
        return w2d * s[:, None], s * (cb - m) + be

    # conv1: (C, Cin, 1, 1) -> (Cpad, Cin)
    w1, b1 = fold(p["conv1_w"][:, :, 0, 0].astype(f32), p["conv1_b"],
                  p["bn1_g"], p["bn1_b"], p["bn1_m"], p["bn1_v"])
    w1p = jnp.zeros((Cpad, Cin), f32).at[:C].set(w1).astype(compute_dtype)
    b1p = jnp.zeros((Cpad, 1), f32).at[:C, 0].set(b1)

    # conv2: (C, C, 3, 3) OIHW -> (9, Cpad_out, Cpad_in), tap k = ky*3 + kx
    s2 = p["bn2_g"] / jnp.sqrt(p["bn2_v"] + eps)
    w2 = p["conv2_w"].astype(f32) * s2[:, None, None, None]
    b2 = s2 * (p["conv2_b"] - p["bn2_m"]) + p["bn2_b"]
    w2 = jnp.transpose(w2, (2, 3, 0, 1)).reshape(9, C, C)
    w2p = (jnp.zeros((9, Cpad, Cpad), f32).at[:, :C, :C].set(w2)
           .astype(compute_dtype))
    b2p = jnp.zeros((Cpad, 1), f32).at[:C, 0].set(b2)

    # conv3: (Cexp, C, 1, 1) -> (Cexp, Cpad)
    w3, b3 = fold(p["conv3_w"][:, :, 0, 0].astype(f32), p["conv3_b"],
                  p["bn3_g"], p["bn3_b"], p["bn3_m"], p["bn3_v"])
    w3p = jnp.zeros((Cexp, Cpad), f32).at[:, :C].set(w3).astype(compute_dtype)
    b3p = b3.reshape(Cexp, 1).astype(f32)

    # channels-first with batch folded into the lane axis: (Cin, N*H*W)
    x_cf = (x_nchw.reshape(N, Cin, HW).transpose(1, 0, 2)
            .reshape(Cin, N * HW).astype(compute_dtype))

    BT = _pick_batch_tile(N, HW)                         # images per grid step
    L = BT * HW                                          # lane width per step
    grid = (N // BT,)

    kernel = functools.partial(_bottleneck_kernel, H=H, W=W)
    const2 = lambda g: (0, 0)

    out = pl.pallas_call(
        kernel,
        out_shape=jax.ShapeDtypeStruct((Cexp, N * HW), x_nchw.dtype),
        grid=grid,
        in_specs=[
            pl.BlockSpec((Cin, L), lambda g: (0, g)),          # x
            pl.BlockSpec((Cpad, Cin), const2),                 # w1
            pl.BlockSpec((Cpad, 1), const2),                   # b1
            pl.BlockSpec((9, Cpad, Cpad), lambda g: (0, 0, 0)),  # w2 per-tap
            pl.BlockSpec((Cpad, 1), const2),                   # b2
            pl.BlockSpec((Cexp, Cpad), const2),                # w3
            pl.BlockSpec((Cexp, 1), const2),                   # b3
        ],
        out_specs=pl.BlockSpec((Cexp, L), lambda g: (0, g)),   # lane-dense out
        compiler_params=pltpu.CompilerParams(
            dimension_semantics=("parallel",),
            vmem_limit_bytes=32 * 1024 * 1024,
        ),
    )(x_cf, w1p, b1p, w2p, b2p, w3p, b3p)

    return (out.reshape(Cexp, N, HW).transpose(1, 0, 2)
            .reshape(N, Cexp, H, W))


# ----------------------------- pure-JAX reference -----------------------------

def reference_forward(x_nchw, p, eps=1e-5):
    hp = jax.lax.Precision.HIGHEST

    def conv2d(x, w, b, stride, pad):
        y = jax.lax.conv_general_dilated(
            x, w, (stride, stride), [(pad, pad), (pad, pad)],
            dimension_numbers=("NCHW", "OIHW", "NCHW"), precision=hp)
        return y + b[None, :, None, None]

    def bn(x, g, be, m, v):
        return (g[None, :, None, None] * (x - m[None, :, None, None])
                / jnp.sqrt(v + eps)[None, :, None, None] + be[None, :, None, None])

    identity = x_nchw
    x = jax.nn.relu(bn(conv2d(x_nchw, p["conv1_w"], p["conv1_b"], 1, 0),
                       p["bn1_g"], p["bn1_b"], p["bn1_m"], p["bn1_v"]))
    x = jax.nn.relu(bn(conv2d(x, p["conv2_w"], p["conv2_b"], 1, 1),
                       p["bn2_g"], p["bn2_b"], p["bn2_m"], p["bn2_v"]))
    x = bn(conv2d(x, p["conv3_w"], p["conv3_b"], 1, 0),
           p["bn3_g"], p["bn3_b"], p["bn3_m"], p["bn3_v"])
    return jax.nn.relu(x + identity)


# ----------------------------- main -----------------------------

if __name__ == "__main__":
    N, H, W = 2, 16, 16
    out_channels = 4
    expansion = 4
    in_channels = out_channels * expansion      # 16, so the residual add is valid

    key = jax.random.PRNGKey(0)
    ks = jax.random.split(key, 20)

    def u(k, shape, lo=-0.1, hi=0.1):
        return jax.random.uniform(k, shape, jnp.float32, lo, hi)

    C, Cexp = out_channels, out_channels * expansion
    params = {
        "conv1_w": u(ks[0], (C, in_channels, 1, 1)), "conv1_b": u(ks[1], (C,)),
        "bn1_g": u(ks[2], (C,), 0.5, 1.5), "bn1_b": u(ks[3], (C,)),
        "bn1_m": u(ks[4], (C,)), "bn1_v": u(ks[5], (C,), 0.5, 1.5),
        "conv2_w": u(ks[6], (C, C, 3, 3)), "conv2_b": u(ks[7], (C,)),
        "bn2_g": u(ks[8], (C,), 0.5, 1.5), "bn2_b": u(ks[9], (C,)),
        "bn2_m": u(ks[10], (C,)), "bn2_v": u(ks[11], (C,), 0.5, 1.5),
        "conv3_w": u(ks[12], (Cexp, C, 1, 1)), "conv3_b": u(ks[13], (Cexp,)),
        "bn3_g": u(ks[14], (Cexp,), 0.5, 1.5), "bn3_b": u(ks[15], (Cexp,)),
        "bn3_m": u(ks[16], (Cexp,)), "bn3_v": u(ks[17], (Cexp,), 0.5, 1.5),
    }

    x = jax.random.normal(ks[18], (N, in_channels, H, W), jnp.float32)

    ref = jax.block_until_ready(reference_forward(x, params))

    # f32 configuration: tighter tolerance.
    out_f32 = jax.block_until_ready(
        bottleneck_forward(x, params, compute_dtype=jnp.float32))
    assert out_f32.shape == (N, Cexp, H, W), out_f32.shape
    np.testing.assert_allclose(np.asarray(out_f32), np.asarray(ref),
                               rtol=1e-2, atol=1e-2)

    # bf16 configuration (default / fast path): looser tolerance.
    out_bf16 = jax.block_until_ready(
        bottleneck_forward(x, params, compute_dtype=jnp.bfloat16))
    assert out_bf16.shape == (N, Cexp, H, W), out_bf16.shape
    np.testing.assert_allclose(np.asarray(out_bf16), np.asarray(ref),
                               rtol=3e-2, atol=3e-2)

    print("KERNEL_OK")
</pallas_src>

<mosaic_0001>
module attributes {stable_mosaic.version = 11 : i64} {
  func.func @_bottleneck_kernel(%arg0: i32, %arg1: memref<16x512xf32, #tpu.memory_space<vmem>>, %arg2: memref<8x16xf32, #tpu.memory_space<vmem>>, %arg3: memref<8x1xf32, #tpu.memory_space<vmem>>, %arg4: memref<9x8x8xf32, #tpu.memory_space<vmem>>, %arg5: memref<8x1xf32, #tpu.memory_space<vmem>>, %arg6: memref<16x8xf32, #tpu.memory_space<vmem>>, %arg7: memref<16x1xf32, #tpu.memory_space<vmem>>, %arg8: memref<16x512xf32, #tpu.memory_space<vmem>>) attributes {dimension_semantics = [#tpu.dimension_semantics<parallel>], iteration_bounds = array<i64: 1>, scalar_prefetch = 0 : i64, scratch_operands = 0 : i64, tpu.core_type = #tpu.core_type<tc>, window_params = [{transform_indices = @transform_0, window_bounds = array<i64: 16, 512>}, {pipeline_mode = #tpu.pipeline_mode<synchronous>, transform_indices = @transform_1, window_bounds = array<i64: 8, 16>}, {pipeline_mode = #tpu.pipeline_mode<synchronous>, transform_indices = @transform_2, window_bounds = array<i64: 8, 1>}, {pipeline_mode = #tpu.pipeline_mode<synchronous>, transform_indices = @transform_3, window_bounds = array<i64: 9, 8, 8>}, {pipeline_mode = #tpu.pipeline_mode<synchronous>, transform_indices = @transform_4, window_bounds = array<i64: 8, 1>}, {pipeline_mode = #tpu.pipeline_mode<synchronous>, transform_indices = @transform_5, window_bounds = array<i64: 16, 8>}, {pipeline_mode = #tpu.pipeline_mode<synchronous>, transform_indices = @transform_6, window_bounds = array<i64: 16, 1>}, {transform_indices = @transform_7, window_bounds = array<i64: 16, 512>}]} {
    %c0 = arith.constant 0 : index
    %c0_0 = arith.constant 0 : index
    %0 = vector.load %arg1[%c0, %c0_0] : memref<16x512xf32, #tpu.memory_space<vmem>>, vector<16x512xf32>
    %c0_1 = arith.constant 0 : index
    %c0_2 = arith.constant 0 : index
    %1 = vector.load %arg2[%c0_1, %c0_2] : memref<8x16xf32, #tpu.memory_space<vmem>>, vector<8x16xf32>
    %cst = arith.constant dense<0.000000e+00> : vector<8x512xf32>
    %2 = tpu.matmul %1, %0, %cst {dimension_numbers = #tpu.dot_dimension_numbers<[1], [0], [0], [1], [0, 0, 1, 1], [], []>} : vector<8x16xf32>, vector<16x512xf32>, vector<8x512xf32> -> vector<8x512xf32>
    %c0_3 = arith.constant 0 : index
    %c0_4 = arith.constant 0 : index
    %3 = vector.load %arg3[%c0_3, %c0_4] : memref<8x1xf32, #tpu.memory_space<vmem>>, vector<8x1xf32>
    %4 = vector.broadcast %3 : vector<8x1xf32> to vector<8x512xf32>
    %5 = arith.addf %2, %4 : vector<8x512xf32>
    %cst_5 = arith.constant 0.000000e+00 : f32
    %6 = vector.broadcast %cst_5 : f32 to vector<8x512xf32>
    %7 = arith.maximumf %5, %6 : vector<8x512xf32>
    %8 = tpu.iota {dimensions = array<i32: 1>} : vector<1x512xi32>
    %c15_i32 = arith.constant 15 : i32
    %9 = vector.broadcast %c15_i32 : i32 to vector<1x512xi32>
    %10 = arith.andi %8, %9 : vector<1x512xi32>
    %c4_i32 = arith.constant 4 : i32
    %11 = vector.broadcast %c4_i32 : i32 to vector<1x512xi32>
    %12 = arith.shrsi %8, %11 : vector<1x512xi32>
    %c15_i32_6 = arith.constant 15 : i32
    %13 = vector.broadcast %c15_i32_6 : i32 to vector<1x512xi32>
    %14 = arith.andi %12, %13 : vector<1x512xi32>
    %c1_i32 = arith.constant 1 : i32
    %15 = vector.broadcast %c1_i32 : i32 to vector<1x512xi32>
    %16 = arith.cmpi sge, %10, %15 : vector<1x512xi32>
    %c14_i32 = arith.constant 14 : i32
    %17 = vector.broadcast %c14_i32 : i32 to vector<1x512xi32>
    %18 = arith.cmpi sle, %10, %17 : vector<1x512xi32>
    %c1_i32_7 = arith.constant 1 : i32
    %19 = vector.broadcast %c1_i32_7 : i32 to vector<1x512xi32>
    %20 = arith.cmpi sge, %14, %19 : vector<1x512xi32>
    %c14_i32_8 = arith.constant 14 : i32
    %21 = vector.broadcast %c14_i32_8 : i32 to vector<1x512xi32>
    %22 = arith.cmpi sle, %14, %21 : vector<1x512xi32>
    %c17_i32 = arith.constant 17 : i32
    %23 = tpu.dynamic_rotate %7 by %c17_i32 dim 1 : vector<8x512xf32>, i32 -> vector<8x512xf32>
    %24 = arith.andi %20, %16 : vector<1x512xi1>
    %cst_9 = arith.constant 0.000000e+00 : f32
    %25 = vector.broadcast %cst_9 : f32 to vector<8x512xf32>
    %26 = vector.shape_cast %24 : vector<1x512xi1> to vector<1x512xi1>
    %27 = vector.broadcast %26 : vector<1x512xi1> to vector<8x512xi1>
    %28 = arith.select %27, %23, %25 : vector<8x512xi1>, vector<8x512xf32>
    %c0_10 = arith.constant 0 : index
    %c0_11 = arith.constant 0 : index
    %c0_12 = arith.constant 0 : index
    %29 = vector.load %arg4[%c0_10, %c0_11, %c0_12] : memref<9x8x8xf32, #tpu.memory_space<vmem>>, vector<1x8x8xf32>
    %30 = vector.shape_cast %29 : vector<1x8x8xf32> to vector<8x8xf32>
    %cst_13 = arith.constant dense<0.000000e+00> : vector<8x512xf32>
    %31 = tpu.matmul %30, %28, %cst_13 {dimension_numbers = #tpu.dot_dimension_numbers<[1], [0], [0], [1], [0, 0, 1, 1], [], []>} : vector<8x8xf32>, vector<8x512xf32>, vector<8x512xf32> -> vector<8x512xf32>
    %c16_i32 = arith.constant 16 : i32
    %32 = tpu.dynamic_rotate %7 by %c16_i32 dim 1 : vector<8x512xf32>, i32 -> vector<8x512xf32>
    %cst_14 = arith.constant 0.000000e+00 : f32
    %33 = vector.broadcast %cst_14 : f32 to vector<8x512xf32>
    %34 = vector.shape_cast %20 : vector<1x512xi1> to vector<1x512xi1>
    %35 = vector.broadcast %34 : vector<1x512xi1> to vector<8x512xi1>
    %36 = arith.select %35, %32, %33 : vector<8x512xi1>, vector<8x512xf32>
    %c1 = arith.constant 1 : index
    %c0_15 = arith.constant 0 : index
    %c0_16 = arith.constant 0 : index
    %37 = vector.load %arg4[%c1, %c0_15, %c0_16] : memref<9x8x8xf32, #tpu.memory_space<vmem>>, vector<1x8x8xf32>
    %38 = vector.shape_cast %37 : vector<1x8x8xf32> to vector<8x8xf32>
    %cst_17 = arith.constant dense<0.000000e+00> : vector<8x512xf32>
    %39 = tpu.matmul %38, %36, %cst_17 {dimension_numbers = #tpu.dot_dimension_numbers<[1], [0], [0], [1], [0, 0, 1, 1], [], []>} : vector<8x8xf32>, vector<8x512xf32>, vector<8x512xf32> -> vector<8x512xf32>
    %40 = arith.addf %31, %39 : vector<8x512xf32>
    %c15_i32_18 = arith.constant 15 : i32
    %41 = tpu.dynamic_rotate %7 by %c15_i32_18 dim 1 : vector<8x512xf32>, i32 -> vector<8x512xf32>
    %42 = arith.andi %20, %18 : vector<1x512xi1>
    %cst_19 = arith.constant 0.000000e+00 : f32
    %43 = vector.broadcast %cst_19 : f32 to vector<8x512xf32>
    %44 = vector.shape_cast %42 : vector<1x512xi1> to vector<1x512xi1>
    %45 = vector.broadcast %44 : vector<1x512xi1> to vector<8x512xi1>
    %46 = arith.select %45, %41, %43 : vector<8x512xi1>, vector<8x512xf32>
    %c2 = arith.constant 2 : index
    %c0_20 = arith.constant 0 : index
    %c0_21 = arith.constant 0 : index
    %47 = vector.load %arg4[%c2, %c0_20, %c0_21] : memref<9x8x8xf32, #tpu.memory_space<vmem>>, vector<1x8x8xf32>
    %48 = vector.shape_cast %47 : vector<1x8x8xf32> to vector<8x8xf32>
    %cst_22 = arith.constant dense<0.000000e+00> : vector<8x512xf32>
    %49 = tpu.matmul %48, %46, %cst_22 {dimension_numbers = #tpu.dot_dimension_numbers<[1], [0], [0], [1], [0, 0, 1, 1], [], []>} : vector<8x8xf32>, vector<8x512xf32>, vector<8x512xf32> -> vector<8x512xf32>
    %50 = arith.addf %40, %49 : vector<8x512xf32>
    %c1_i32_23 = arith.constant 1 : i32
    %51 = tpu.dynamic_rotate %7 by %c1_i32_23 dim 1 : vector<8x512xf32>, i32 -> vector<8x512xf32>
    %cst_24 = arith.constant 0.000000e+00 : f32
    %52 = vector.broadcast %cst_24 : f32 to vector<8x512xf32>
    %53 = vector.shape_cast %16 : vector<1x512xi1> to vector<1x512xi1>
    %54 = vector.broadcast %53 : vector<1x512xi1> to vector<8x512xi1>
    %55 = arith.select %54, %51, %52 : vector<8x512xi1>, vector<8x512xf32>
    %c3 = arith.constant 3 : index
    %c0_25 = arith.constant 0 : index
    %c0_26 = arith.constant 0 : index
    %56 = vector.load %arg4[%c3, %c0_25, %c0_26] : memref<9x8x8xf32, #tpu.memory_space<vmem>>, vector<1x8x8xf32>
    %57 = vector.shape_cast %56 : vector<1x8x8xf32> to vector<8x8xf32>
    %cst_27 = arith.constant dense<0.000000e+00> : vector<8x512xf32>
    %58 = tpu.matmul %57, %55, %cst_27 {dimension_numbers = #tpu.dot_dimension_numbers<[1], [0], [0], [1], [0, 0, 1, 1], [], []>} : vector<8x8xf32>, vector<8x512xf32>, vector<8x512xf32> -> vector<8x512xf32>
    %59 = arith.addf %50, %58 : vector<8x512xf32>
    %c4 = arith.constant 4 : index
    %c0_28 = arith.constant 0 : index
    %c0_29 = arith.constant 0 : index
    %60 = vector.load %arg4[%c4, %c0_28, %c0_29] : memref<9x8x8xf32, #tpu.memory_space<vmem>>, vector<1x8x8xf32>
    %61 = vector.shape_cast %60 : vector<1x8x8xf32> to vector<8x8xf32>
    %cst_30 = arith.constant dense<0.000000e+00> : vector<8x512xf32>
    %62 = tpu.matmul %61, %7, %cst_30 {dimension_numbers = #tpu.dot_dimension_numbers<[1], [0], [0], [1], [0, 0, 1, 1], [], []>} : vector<8x8xf32>, vector<8x512xf32>, vector<8x512xf32> -> vector<8x512xf32>
    %63 = arith.addf %59, %62 : vector<8x512xf32>
    %c511_i32 = arith.constant 511 : i32
    %64 = tpu.dynamic_rotate %7 by %c511_i32 dim 1 : vector<8x512xf32>, i32 -> vector<8x512xf32>
    %cst_31 = arith.constant 0.000000e+00 : f32
    %65 = vector.broadcast %cst_31 : f32 to vector<8x512xf32>
    %66 = vector.shape_cast %18 : vector<1x512xi1> to vector<1x512xi1>
    %67 = vector.broadcast %66 : vector<1x512xi1> to vector<8x512xi1>
    %68 = arith.select %67, %64, %65 : vector<8x512xi1>, vector<8x512xf32>
    %c5 = arith.constant 5 : index
    %c0_32 = arith.constant 0 : index
    %c0_33 = arith.constant 0 : index
    %69 = vector.load %arg4[%c5, %c0_32, %c0_33] : memref<9x8x8xf32, #tpu.memory_space<vmem>>, vector<1x8x8xf32>
    %70 = vector.shape_cast %69 : vector<1x8x8xf32> to vector<8x8xf32>
    %cst_34 = arith.constant dense<0.000000e+00> : vector<8x512xf32>
    %71 = tpu.matmul %70, %68, %cst_34 {dimension_numbers = #tpu.dot_dimension_numbers<[1], [0], [0], [1], [0, 0, 1, 1], [], []>} : vector<8x8xf32>, vector<8x512xf32>, vector<8x512xf32> -> vector<8x512xf32>
    %72 = arith.addf %63, %71 : vector<8x512xf32>
    %c497_i32 = arith.constant 497 : i32
    %73 = tpu.dynamic_rotate %7 by %c497_i32 dim 1 : vector<8x512xf32>, i32 -> vector<8x512xf32>
    %74 = arith.andi %22, %16 : vector<1x512xi1>
    %cst_35 = arith.constant 0.000000e+00 : f32
    %75 = vector.broadcast %cst_35 : f32 to vector<8x512xf32>
    %76 = vector.shape_cast %74 : vector<1x512xi1> to vector<1x512xi1>
    %77 = vector.broadcast %76 : vector<1x512xi1> to vector<8x512xi1>
    %78 = arith.select %77, %73, %75 : vector<8x512xi1>, vector<8x512xf32>
    %c6 = arith.constant 6 : index
    %c0_36 = arith.constant 0 : index
    %c0_37 = arith.constant 0 : index
    %79 = vector.load %arg4[%c6, %c0_36, %c0_37] : memref<9x8x8xf32, #tpu.memory_space<vmem>>, vector<1x8x8xf32>
    %80 = vector.shape_cast %79 : vector<1x8x8xf32> to vector<8x8xf32>
    %cst_38 = arith.constant dense<0.000000e+00> : vector<8x512xf32>
    %81 = tpu.matmul %80, %78, %cst_38 {dimension_numbers = #tpu.dot_dimension_numbers<[1], [0], [0], [1], [0, 0, 1, 1], [], []>} : vector<8x8xf32>, vector<8x512xf32>, vector<8x512xf32> -> vector<8x512xf32>
    %82 = arith.addf %72, %81 : vector<8x512xf32>
    %c496_i32 = arith.constant 496 : i32
    %83 = tpu.dynamic_rotate %7 by %c496_i32 dim 1 : vector<8x512xf32>, i32 -> vector<8x512xf32>
    %cst_39 = arith.constant 0.000000e+00 : f32
    %84 = vector.broadcast %cst_39 : f32 to vector<8x512xf32>
    %85 = vector.shape_cast %22 : vector<1x512xi1> to vector<1x512xi1>
    %86 = vector.broadcast %85 : vector<1x512xi1> to vector<8x512xi1>
    %87 = arith.select %86, %83, %84 : vector<8x512xi1>, vector<8x512xf32>
    %c7 = arith.constant 7 : index
    %c0_40 = arith.constant 0 : index
    %c0_41 = arith.constant 0 : index
    %88 = vector.load %arg4[%c7, %c0_40, %c0_41] : memref<9x8x8xf32, #tpu.memory_space<vmem>>, vector<1x8x8xf32>
    %89 = vector.shape_cast %88 : vector<1x8x8xf32> to vector<8x8xf32>
    %cst_42 = arith.constant dense<0.000000e+00> : vector<8x512xf32>
    %90 = tpu.matmul %89, %87, %cst_42 {dimension_numbers = #tpu.dot_dimension_numbers<[1], [0], [0], [1], [0, 0, 1, 1], [], []>} : vector<8x8xf32>, vector<8x512xf32>, vector<8x512xf32> -> vector<8x512xf32>
    %91 = arith.addf %82, %90 : vector<8x512xf32>
    %c495_i32 = arith.constant 495 : i32
    %92 = tpu.dynamic_rotate %7 by %c495_i32 dim 1 : vector<8x512xf32>, i32 -> vector<8x512xf32>
    %93 = arith.andi %22, %18 : vector<1x512xi1>
    %cst_43 = arith.constant 0.000000e+00 : f32
    %94 = vector.broadcast %cst_43 : f32 to vector<8x512xf32>
    %95 = vector.shape_cast %93 : vector<1x512xi1> to vector<1x512xi1>
    %96 = vector.broadcast %95 : vector<1x512xi1> to vector<8x512xi1>
    %97 = arith.select %96, %92, %94 : vector<8x512xi1>, vector<8x512xf32>
    %c8 = arith.constant 8 : index
    %c0_44 = arith.constant 0 : index
    %c0_45 = arith.constant 0 : index
    %98 = vector.load %arg4[%c8, %c0_44, %c0_45] : memref<9x8x8xf32, #tpu.memory_space<vmem>>, vector<1x8x8xf32>
    %99 = vector.shape_cast %98 : vector<1x8x8xf32> to vector<8x8xf32>
    %cst_46 = arith.constant dense<0.000000e+00> : vector<8x512xf32>
    %100 = tpu.matmul %99, %97, %cst_46 {dimension_numbers = #tpu.dot_dimension_numbers<[1], [0], [0], [1], [0, 0, 1, 1], [], []>} : vector<8x8xf32>, vector<8x512xf32>, vector<8x512xf32> -> vector<8x512xf32>
    %101 = arith.addf %91, %100 : vector<8x512xf32>
    %c0_47 = arith.constant 0 : index
    %c0_48 = arith.constant 0 : index
    %102 = vector.load %arg5[%c0_47, %c0_48] : memref<8x1xf32, #tpu.memory_space<vmem>>, vector<8x1xf32>
    %103 = vector.broadcast %102 : vector<8x1xf32> to vector<8x512xf32>
    %104 = arith.addf %101, %103 : vector<8x512xf32>
    %cst_49 = arith.constant 0.000000e+00 : f32
    %105 = vector.broadcast %cst_49 : f32 to vector<8x512xf32>
    %106 = arith.maximumf %104, %105 : vector<8x512xf32>
    %c0_50 = arith.constant 0 : index
    %c0_51 = arith.constant 0 : index
    %107 = vector.load %arg6[%c0_50, %c0_51] : memref<16x8xf32, #tpu.memory_space<vmem>>, vector<16x8xf32>
    %cst_52 = arith.constant dense<0.000000e+00> : vector<16x512xf32>
    %108 = tpu.matmul %107, %106, %cst_52 {dimension_numbers = #tpu.dot_dimension_numbers<[1], [0], [0], [1], [0, 0, 1, 1], [], []>} : vector<16x8xf32>, vector<8x512xf32>, vector<16x512xf32> -> vector<16x512xf32>
    %c0_53 = arith.constant 0 : index
    %c0_54 = arith.constant 0 : index
    %109 = vector.load %arg7[%c0_53, %c0_54] : memref<16x1xf32, #tpu.memory_space<vmem>>, vector<16x1xf32>
    %110 = vector.broadcast %109 : vector<16x1xf32> to vector<16x512xf32>
    %111 = arith.addf %108, %110 : vector<16x512xf32>
    %112 = arith.addf %111, %0 : vector<16x512xf32>
    %cst_55 = arith.constant 0.000000e+00 : f32
    %113 = vector.broadcast %cst_55 : f32 to vector<16x512xf32>
    %114 = arith.maximumf %112, %113 : vector<16x512xf32>
    %c0_56 = arith.constant 0 : index
    %c0_57 = arith.constant 0 : index
    %115 = vector.load %arg8[%c0_56, %c0_57] : memref<16x512xf32, #tpu.memory_space<vmem>>, vector<16x512xf32>
    tpu.vector_store %arg8[%c0_56, %c0_57], %114 {strides = array<i32>} : memref<16x512xf32, #tpu.memory_space<vmem>>, vector<16x512xf32>,
    return
  }
  func.func @transform_0(%arg0: i32) -> (i32, i32) {
    %c0_i32 = arith.constant 0 : i32
    %c0_i32_0 = arith.constant 0 : i32
    return %c0_i32, %arg0 : i32, i32
  }
  func.func @transform_1(%arg0: i32) -> (i32, i32) {
    %c0_i32 = arith.constant 0 : i32
    %c0_i32_0 = arith.constant 0 : i32
    %c0_i32_1 = arith.constant 0 : i32
    return %c0_i32, %c0_i32_0 : i32, i32
  }
  func.func @transform_2(%arg0: i32) -> (i32, i32) {
    %c0_i32 = arith.constant 0 : i32
    %c0_i32_0 = arith.constant 0 : i32
    %c0_i32_1 = arith.constant 0 : i32
    return %c0_i32, %c0_i32_0 : i32, i32
  }
  func.func @transform_3(%arg0: i32) -> (i32, i32, i32) {
    %c0_i32 = arith.constant 0 : i32
    %c0_i32_0 = arith.constant 0 : i32
    %c0_i32_1 = arith.constant 0 : i32
    %c0_i32_2 = arith.constant 0 : i32
    return %c0_i32, %c0_i32_0, %c0_i32_1 : i32, i32, i32
  }
  func.func @transform_4(%arg0: i32) -> (i32, i32) {
    %c0_i32 = arith.constant 0 : i32
    %c0_i32_0 = arith.constant 0 : i32
    %c0_i32_1 = arith.constant 0 : i32
    return %c0_i32, %c0_i32_0 : i32, i32
  }
  func.func @transform_5(%arg0: i32) -> (i32, i32) {
    %c0_i32 = arith.constant 0 : i32
    %c0_i32_0 = arith.constant 0 : i32
    %c0_i32_1 = arith.constant 0 : i32
    return %c0_i32, %c0_i32_0 : i32, i32
  }
  func.func @transform_6(%arg0: i32) -> (i32, i32) {
    %c0_i32 = arith.constant 0 : i32
    %c0_i32_0 = arith.constant 0 : i32
    %c0_i32_1 = arith.constant 0 : i32
    return %c0_i32, %c0_i32_0 : i32, i32
  }
  func.func @transform_7(%arg0: i32) -> (i32, i32) {
    %c0_i32 = arith.constant 0 : i32
    %c0_i32_0 = arith.constant 0 : i32
    return %c0_i32, %arg0 : i32, i32
  }
}

</mosaic_0001>

<bundles_post_ra>
// kernel: tpu_custom_call.1
= control target key start
LH: loop header
LB: loop body
LE: loop exit
PB: predicated region body
PF: predicated region fallthrough
CT: control target
= control target key end

     0   :  { %vm42_vm0 = vcmask 130048   ;;  %s2662_s0 = inlined_call_operand.vmem [shape: f32[16,512], index: 0, kind: input, shape index: {}]   ;;  %s2663_s1 = inlined_call_operand.vmem [shape: f32[8,16], index: 1, kind: input, shape index: {}]   ;;  %s2664_s2 = inlined_call_operand.vmem [shape: f32[8,1], index: 2, kind: input, shape index: {}]   ;;  %s2665_s3 = inlined_call_operand.vmem [shape: f32[9,8,8], index: 3, kind: input, shape index: {}]   ;;  %s2666_s4 = inlined_call_operand.vmem [shape: f32[8,1], index: 4, kind: input, shape index: {}]   ;;  %s2667_s5 = inlined_call_operand.vmem [shape: f32[16,8], index: 5, kind: input, shape index: {}]   ;;  %s2668_s6 = inlined_call_operand.vmem [shape: f32[16,1], index: 6, kind: input, shape index: {}]   ;;  %s2669_s7 = inlined_call_operand.hbm [shape: f32[16,512], index: 7, kind: output, shape index: {}]  }
   0x1   :  { %v2177_v0 = vld [vmem:[%s2662_s0 + $0x28] sm:$0xff]  ;;  %v2182_v1 = vld [vmem:[%s2662_s0 + $0x38] sm:$0xff]  ;;  %v2187_v2 = vld [vmem:[%s2662_s0 + $0x20] sm:$0xff] }
   0x2   :  { %74 = vmatprep.subr.mxu0 %v2177_v0  ;;  %145 = vmatprep.subr.mxu1 %v2182_v1  ;;  %v2194_v3 = vld [vmem:[%s2662_s0 + $0x30] sm:$0xff]  ;;  %v2199_v4 = vld [vmem:[%s2662_s0 + $0x8] sm:$0xff]  ;;  %v2204_v5 = vld [vmem:[%s2662_s0 + $0x18] sm:$0xff] }
   0x3   :  { %75 = vmatpush1.msra.mxu0 %v2187_v2  ;;  %146 = vmatpush1.msra.mxu1 %v2194_v3  ;;  %v2211_v6 = vld [vmem:[%s2662_s0] sm:$0xff]  ;;  %v2216_v7 = vld [vmem:[%s2662_s0 + $0x10] sm:$0xff] }
   0x4   :  { %76 = vmatprep.subr.mxu0 %v2199_v4  ;;  %147 = vmatprep.subr.mxu1 %v2204_v5  ;;  %v35_v8 = vld [vmem:[%s2663_s1] sm:$0xff] }
   0x5   :  { %12 = vsyncpa [#allocation3], 0  ;;  %77 = vmatpush1.msra.mxu0 %v2211_v6  ;;  %v2121_v9 = vmov 0.0   ;;  %148 = vmatpush1.msra.mxu1 %v2216_v7  ;;  %v36_v10 = vld [vmem:[%s2664_s2] sm:$0xff]  ;;  %v2122_v11 = vmov 0   ;;  %s2123_s1 = smov 16   ;;  %v192_v28 = vlaneseq }
   0x6   :  { %110 = vmatprep.mubr.f32.mxu0 %v2121_v9  ;;  %181 = vmatprep.mubr.f32.mxu1 %v2121_v9  ;;  %s2124_s2 = smov 17   ;;  %s2125_s20 = smov 15   ;;  %v1808_v25 = vld [vmem:[%s2668_s6] sm:$0xff]  ;;  %v1809_v27 = vld [vmem:[%s2668_s6 + $0x8] sm:$0xff] }
   0x7   :  { %2020 = vmatmul.mubr.msk.f32.vlgmr.msra.gmra.mxu0 %vm42_vm0, %v35_v8  ;;  %2021 = vmatmul.mubr.msk.f32.vlgmr.msra.gmra.mxu1 %vm42_vm0, %v35_v8  ;;  %s2126_s21 = smov 1   ;;  %s2127_s22 = smov 127   ;;  %v1792_v26 = vld [vmem:[%s2666_s4] sm:$0xff]  ;;  %v2281_v29 = vand.u32 127, %v192_v28  ;;  %v2684_v8 = vmov 0  ;;  %v2052_v61 = vld [vmem:[%s2665_s3 + $0x28] sm:$0xff] }
   0x8   :  { %2097 = vset.pattern.permute.xlu0 %v2122_v11  ;;  %421 = vmatprep.mubr.f32.mxu1 %v2121_v9  ;;  %s2128_s23 = smov 113   ;;  %s2129_s24 = smov 112  }
   0x9   :  { %39 = vperm.xlu0 %2097, %v36_v10   ;;  %350 = vmatprep.mubr.f32.mxu0 %v2121_v9  ;;  %s2130_s25 = smov 111   ;;  %v196_v30 = vadd.s32 384, %v2281_v29  ;;  %vm263_vm1 = vcmp.lt.s32.totalorder %v2281_v29, 16  ;;  %v194_v42 = vadd.s32 128, %v2281_v29  ;;  %v195_v43 = vadd.s32 256, %v2281_v29 }
   0xa   :  { %2098 = vset.pattern.permute.xlu1 %v2122_v11  ;;  %v201_v48 = vshra.s32 %v2281_v29, 4  ;;  %v197_v57 = vand.u32 15, %v2281_v29  ;;  %vm233_vm14 = vcmp.lt.s32.totalorder %v2281_v29, 17 }
   0xb   :  { %v204_v31 = vshra.s32 %v196_v30, 4  ;;  %v202_v46 = vshra.s32 %v194_v42, 4  ;;  %v203_v47 = vshra.s32 %v195_v43, 4  ;;  %v200_v51 = vand.u32 15, %v196_v30 }
   0xc   :  { %v198_v53 = vand.u32 15, %v194_v42  ;;  %v199_v55 = vand.u32 15, %v195_v43  ;;  %v2311_v56 = vand.u32 15, %v201_v48  ;;  %vm2341_vm10 = vcmp.ge.s32.totalorder %v197_v57, 1 }
   0xd   :  { %v2284_v32 = vand.u32 15, %v204_v31  ;;  %v2307_v52 = vand.u32 15, %v202_v46  ;;  %v2309_v54 = vand.u32 15, %v203_v47  ;;  %vm2318_vm3 = vcmp.ge.s32.totalorder %v200_v51, 1 }
   0xe   :  { %vm2323_vm5 = vcmp.ge.s32.totalorder %v198_v53, 1  ;;  %vm2328_vm7 = vcmp.ge.s32.totalorder %v199_v55, 1  ;;  %vm2675_vm8 = vcmp.ge.s32.totalorder %v2311_v56, 1  ;;  %v2685_v8 = vsel %vm2341_vm10, 4294967295, %v2684_v8 }
   0xf   :  { %vm2670_vm2 = vcmp.ge.s32.totalorder %v2284_v32, 1  ;;  %vm2672_vm4 = vcmp.ge.s32.totalorder %v2307_v52, 1  ;;  %vm2671_vm6 = vcmp.ge.s32.totalorder %v2309_v54, 1  ;;  %vm2356_vm13 = vcmp.le.s32.totalorder %v200_v51, 14  ;;  %v2042_v51 = vld [vmem:[%s2665_s3 + $0x18] sm:$0xff] }
  0x10   :  { %vm2337_vm9 = vmand %vm2670_vm2, %vm2318_vm3  ;;  %vm2373_vm0 = vcmp.le.s32.totalorder %v198_v53, 14  ;;  %vm2425_vm11 = vcmp.le.s32.totalorder %v197_v57, 14 }
  0x11   :  { %vm2352_vm12 = vmand %vm2672_vm4, %vm2323_vm5 }
  0x12   :  { %vm2369_vm15 = vmand %vm2671_vm6, %vm2328_vm7 }
  0x84   :  { %v40_v12 = vpop.permute.xlu0 %39 }
  0xc7   :  { %v112_v13 = vpop.f32.mrf.mxu0  ;;  %v183_v14 = vpop.f32.mrf.mxu1 }
  0xc8   :  { %v113_v15 = vadd.f32 %v112_v13, %v40_v12  ;;  %v184_v16 = vadd.f32 %v183_v14, %v40_v12 }
  0xc9   :  { %v185_v17 = vpop.f32.mrf.mxu1  ;;  %v114_v21 = vpop.f32.mrf.mxu0 }
  0xca   :  { %v2232_v18 = vmax.f32 %v113_v15, 0.0  ;;  %v2234_v19 = vmax.f32 %v184_v16, 0.0  ;;  %v186_v20 = vadd.f32 %v185_v17, %v40_v12  ;;  %v115_v22 = vadd.f32 %v114_v21, %v40_v12  ;;  %v2022_v12 = vld [vmem:[%s2665_s3 + $0x8] sm:$0xff] }
  0xcc   :  { %259 = vrot.lane.b32.xlu1 %v2234_v19, %s2123_s1  ;;  %255 = vrot.lane.b32.xlu0 %v2232_v18, %s2123_s1  ;;  %v2238_v23 = vmax.f32 %v186_v20, 0.0  ;;  %v2242_v24 = vmax.f32 %v115_v22, 0.0 }
  0xd0   :  { %225 = vrot.lane.b32.xlu1 %v2232_v18, %s2124_s2  ;;  %261 = vrot.lane.b32.xlu0 %v2238_v23, %s2123_s1 }
  0xd4   :  { %229 = vrot.lane.b32.xlu1 %v2234_v19, %s2124_s2  ;;  %227 = vrot.lane.b32.xlu0 %v2242_v24, %s2124_s2 }
  0xd8   :  { %573 = vrot.lane.b32.xlu1 %v2232_v18, %s2125_s20  ;;  %231 = vrot.lane.b32.xlu0 %v2238_v23, %s2124_s2 }
  0xdc   :  { %577 = vrot.lane.b32.xlu1 %v2234_v19, %s2125_s20  ;;  %575 = vrot.lane.b32.xlu0 %v2242_v24, %s2125_s20 }
  0xe0   :  { %753 = vrot.lane.b32.xlu1 %v2232_v18, %s2126_s21  ;;  %579 = vrot.lane.b32.xlu0 %v2238_v23, %s2125_s20 }
  0xe4   :  { %757 = vrot.lane.b32.xlu1 %v2234_v19, %s2126_s21  ;;  %755 = vrot.lane.b32.xlu0 %v2242_v24, %s2126_s21 }
  0xe8   :  { %257 = vrot.lane.b32.xlu1 %v2242_v24, %s2123_s1  ;;  %759 = vrot.lane.b32.xlu0 %v2238_v23, %s2126_s21 }
  0xec   :  { %1080 = vrot.lane.b32.xlu1 %v2232_v18, %s2127_s22  ;;  %1082 = vrot.lane.b32.xlu0 %v2242_v24, %s2127_s22 }
  0xf0   :  { %1084 = vrot.lane.b32.xlu1 %v2234_v19, %s2127_s22  ;;  %1086 = vrot.lane.b32.xlu0 %v2238_v23, %s2127_s22 }
  0xf4   :  { %1256 = vrot.lane.b32.xlu1 %v2232_v18, %s2128_s23  ;;  %1258 = vrot.lane.b32.xlu0 %v2242_v24, %s2128_s23 }
  0xf8   :  { %1260 = vrot.lane.b32.xlu1 %v2234_v19, %s2128_s23  ;;  %1262 = vrot.lane.b32.xlu0 %v2238_v23, %s2128_s23 }
  0xfc   :  { %1436 = vrot.lane.b32.xlu1 %v2232_v18, %s2129_s24  ;;  %1438 = vrot.lane.b32.xlu0 %v2242_v24, %s2129_s24 }
 0x100   :  { %1440 = vrot.lane.b32.xlu1 %v2234_v19, %s2129_s24  ;;  %1442 = vrot.lane.b32.xlu0 %v2238_v23, %s2129_s24 }
 0x104   :  { %1612 = vrot.lane.b32.xlu1 %v2232_v18, %s2130_s25  ;;  %1614 = vrot.lane.b32.xlu0 %v2242_v24, %s2130_s25 }
 0x108   :  { %1616 = vrot.lane.b32.xlu1 %v2234_v19, %s2130_s25  ;;  %1618 = vrot.lane.b32.xlu0 %v2238_v23, %s2130_s25 }
 0x10c   :  { %1812 = vperm.xlu0 %2097, %v1808_v25   ;;  %1795 = vperm.xlu1 %2098, %v1792_v26  }
 0x110   :  { %1817 = vperm.xlu1 %2098, %v1809_v27  }
 0x13e   :  { %v260_v33 = vpop.permute.xlu1 %259  ;;  %v256_v34 = vpop.permute.xlu0 %255 }
 0x142   :  { %v2288_v35 = vpop.permute.xlu1 %225  ;;  %v262_v36 = vpop.permute.xlu0 %261 }
 0x143   :  { %v264_v37 = vsel %vm263_vm1, %v260_v33, %v262_v36  ;;  %v267_v21 = vsel %vm263_vm1, %v262_v36, %v256_v34 }
 0x144   :  { %2026 = vmatprep.subr.msk.mxu1 %vm2670_vm2, %v264_v37  ;;  %vm2387_vm2 = vmand %vm2675_vm8, %vm2341_vm10  ;;  %vm2405_vm10 = vcmp.le.s32.totalorder %v199_v55, 14 }
 0x146   :  { %v230_v38 = vpop.permute.xlu1 %229  ;;  %v228_v39 = vpop.permute.xlu0 %227 }
 0x147   :  { %v235_v28 = vsel %vm233_vm14, %v228_v39, %v230_v38  ;;  %v236_v30 = vsel %vm233_vm14, %v2288_v35, %v228_v39 }
 0x14a   :  { %v2294_v40 = vpop.permute.xlu1 %573  ;;  %v232_v41 = vpop.permute.xlu0 %231 }
 0x14b   :  { %v234_v25 = vsel %vm233_vm14, %v230_v38, %v232_v41  ;;  %v237_v36 = vsel %vm233_vm14, %v232_v41, %v2288_v35  ;;  %v254_v38 = vld [vmem:[%s2665_s3] sm:$0xff] }
 0x14e   :  { %v2298_v44 = vpop.permute.xlu1 %577  ;;  %v2300_v45 = vpop.permute.xlu0 %575 }
 0x152   :  { %v2303_v49 = vpop.permute.xlu1 %753  ;;  %v2305_v50 = vpop.permute.xlu0 %579 }
 0x156   :  { %v2314_v58 = vpop.permute.xlu1 %757  ;;  %v2316_v59 = vpop.permute.xlu0 %755 }
 0x15a   :  { %v258_v10 = vpop.permute.xlu1 %257  ;;  %v760_v11 = vpop.permute.xlu0 %759 }
 0x15b   :  { %v265_v15 = vsel %vm263_vm1, %v258_v10, %v260_v33  ;;  %v266_v16 = vsel %vm263_vm1, %v256_v34, %v258_v10  ;;  %vm2696_vm1 = vcmask 64512  }
 0x15c   :  { %2023 = vmatprep.subr.msk.mxu0 %vm2672_vm4, %v266_v16  ;;  %2027 = vmatpush1.msk.msra.mxu1 %vm2671_vm6, %v265_v15  ;;  %vm2697_vm6 = vcmp.ge.s32.totalorder %v2284_v32, 1  ;;  %v2059_v15 = vld [vmem:[%s2665_s3 + $0x30] sm:$0xff] }
 0x15d   :  { %2024 = vmatpush1.msk.msra.mxu0 %vm2675_vm8, %v267_v21  ;;  %2028 = vmatmul.mubr.msk.f32.vlgmr.msra.gmra.mxu1 %vm2696_vm1, %v2022_v12  ;;  %vm2401_vm4 = vmand %vm2697_vm6, %vm2356_vm13 }
 0x15e   :  { %2032 = vmatprep.subr.msk.mxu1 %vm2337_vm9, %v234_v25  ;;  %v2416_v31 = vpop.permute.xlu1 %1080  ;;  %vm2702_vm6 = vmmov %vm2696_vm1  ;;  %v2419_v33 = vpop.permute.xlu0 %1082  ;;  %vm2703_vm1 = vcmp.ge.s32.totalorder %v2307_v52, 1  ;;  %vm2706_vm9 = vcmp.lt.s32.totalorder %v2281_v29, 15  ;;  %2029 = vmatprep.subr.msk.mxu0 %vm2352_vm12, %v236_v30  ;;  %vm2708_vm12 = vcmp.ge.s32.totalorder %v2309_v54, 1  ;;  %v2066_v25 = vld [vmem:[%s2665_s3 + $0x38] sm:$0xff] }
 0x15f   :  { %2025 = vmatmul.mubr.msk.f32.vlgmr.msra.gmra.mxu0 %vm2702_vm6, %v2022_v12  ;;  %vm587_vm8 = vmand %vm2703_vm1, %vm2373_vm0  ;;  %v582_v37 = vsel %vm2706_vm9, %v2298_v44, %v2305_v50  ;;  %2033 = vmatpush1.msk.msra.mxu1 %vm2369_vm15, %v235_v28  ;;  %vm761_vm15 = vcmp.lt.s32.totalorder %v2281_v29, 1  ;;  %vm2709_vm1 = vcmp.ge.s32.totalorder %v2311_v56, 1 }
 0x160   :  { %vm2707_vm6 = vmmov %vm2706_vm9  ;;  %2030 = vmatpush1.msk.msra.mxu0 %vm2387_vm2, %v237_v36  ;;  %2039 = vmatprep.subr.msk.mxu1 %vm2401_vm4, %v582_v37  ;;  %vm2711_vm4 = vcmask 64512   ;;  %v762_v46 = vsel %vm761_vm15, %v2314_v58, %v760_v11 }
 0x161   :  { %v584_v35 = vsel %vm2707_vm6, %v2294_v40, %v2300_v45  ;;  %vm588_vm14 = vmand %vm2708_vm12, %vm2405_vm10  ;;  %566 = vmatprep.mubr.f32.mxu1 %v2121_v9  ;;  %495 = vmatprep.mubr.f32.mxu0 %v2121_v9 }
 0x162   :  { %2036 = vmatprep.subr.msk.mxu0 %vm587_vm8, %v584_v35  ;;  %vm586_vm9 = vmand %vm2709_vm1, %vm2425_vm11  ;;  %2034 = vmatmul.mubr.msk.f32.vlgmr.msra.gmra.mxu1 %vm2711_vm4, %v254_v38  ;;  %v1085_v41 = vpop.permute.xlu1 %1084  ;;  %v1087_v42 = vpop.permute.xlu0 %1086  ;;  %vm2716_vm1 = vnez %v2685_v8 }
 0x163   :  { %vm2710_vm2 = vmmov %vm2707_vm6  ;;  %742 = vmatprep.mubr.f32.mxu1 %v2121_v9 }
 0x164   :  { %v583_v39 = vsel %vm2710_vm2, %v2300_v45, %v2298_v44  ;;  %vm2712_vm8 = vmmov %vm2710_vm2  ;;  %v2035_v44 = vld [vmem:[%s2665_s3 + $0x10] sm:$0xff]  ;;  %v764_v45 = vsel %vm761_vm15, %v2303_v49, %v2316_v59  ;;  %vm224_vm2 = vcmp.le.s32.totalorder %v2284_v32, 14 }
 0x165   :  { %v585_v43 = vsel %vm2712_vm8, %v2305_v50, %v2294_v40  ;;  %2040 = vmatpush1.msk.msra.mxu1 %vm588_vm14, %v583_v39  ;;  %vm2713_vm6 = vmmov %vm2711_vm4  ;;  %v763_v40 = vsel %vm761_vm15, %v2316_v59, %v2314_v58  ;;  %v765_v50 = vsel %vm761_vm15, %v760_v11, %v2303_v49  ;;  %vm1088_vm15 = vcmp.lt.s32.totalorder %v2281_v29, 127 }
 0x166   :  { %2031 = vmatmul.mubr.msk.f32.vlgmr.msra.gmra.mxu0 %vm2713_vm6, %v254_v38  ;;  %2046 = vmatprep.subr.msk.mxu1 %vm2318_vm3, %v762_v46  ;;  %vm2714_vm12 = vmmov %vm2711_vm4  ;;  %v1257_v47 = vpop.permute.xlu1 %1256  ;;  %v1259_v48 = vpop.permute.xlu0 %1258  ;;  %v1092_v55 = vsel %vm1088_vm15, %v1087_v42, %v2416_v31  ;;  %vm222_vm8 = vcmp.le.s32.totalorder %v2307_v52, 14  ;;  %v1091_v59 = vsel %vm1088_vm15, %v2416_v31, %v2419_v33 }
 0x167   :  { %2037 = vmatpush1.msk.msra.mxu0 %vm586_vm9, %v585_v43  ;;  %671 = vmatprep.mubr.f32.mxu0 %v2121_v9  ;;  %vm2715_vm14 = vmmov %vm2711_vm4 }
 0x168   :  { %2043 = vmatprep.subr.msk.mxu0 %vm2323_vm5, %v764_v45  ;;  %2041 = vmatmul.mubr.msk.f32.vlgmr.msra.gmra.mxu1 %vm2714_vm12, %v2035_v44  ;;  %vm2717_vm9 = vmmov %vm2711_vm4  ;;  %vm223_vm12 = vcmp.le.s32.totalorder %v2309_v54, 14 }
 0x169   :  { %2047 = vmatpush1.msk.msra.mxu1 %vm2328_vm7, %v763_v40  ;;  %918 = vmatprep.mubr.f32.mxu1 %v2121_v9  ;;  %vm2533_vm6 = vmand %vm224_vm2, %vm2318_vm3 }
 0x16a   :  { %2038 = vmatmul.mubr.msk.f32.vlgmr.msra.gmra.mxu0 %vm2715_vm14, %v2035_v44  ;;  %1035 = vmatprep.subr.mxu1 %v2238_v23  ;;  %v1261_v49 = vpop.permute.xlu1 %1260  ;;  %v1263_v53 = vpop.permute.xlu0 %1262  ;;  %v2049_v23 = vld [vmem:[%s2665_s3 + $0x20] sm:$0xff]  ;;  %vm1264_vm14 = vcmp.lt.s32.totalorder %v2281_v29, 113  ;;  %vm1270_vm3 = vmand %vm222_vm8, %vm2323_vm5 }
 0x16b   :  { %2044 = vmatpush1.msk.msra.mxu0 %vm2716_vm1, %v765_v50  ;;  %847 = vmatprep.mubr.f32.mxu0 %v2121_v9  ;;  %v1268_v60 = vsel %vm1264_vm14, %v1263_v53, %v1257_v47  ;;  %v1266_v63 = vsel %vm1264_vm14, %v1259_v48, %v1261_v49  ;;  %vm1271_vm5 = vmand %vm223_vm12, %vm2328_vm7  ;;  %v1265_v10 = vsel %vm1264_vm14, %v1261_v49, %v1263_v53 }
 0x16c   :  { %964 = vmatprep.subr.mxu0 %v2242_v24  ;;  %2048 = vmatmul.mubr.msk.f32.vlgmr.msra.gmra.mxu1 %vm2717_vm9, %v2042_v51  ;;  %v1090_v24 = vsel %vm1088_vm15, %v2419_v33, %v1085_v41  ;;  %vm2720_vm9 = vmmov %vm2711_vm4  ;;  %v1267_v12 = vsel %vm1264_vm14, %v1257_v47, %v1259_v48 }
 0x16d   :  { %1036 = vmatpush1.msra.mxu1 %v2234_v19  ;;  %1069 = vmatprep.mubr.f32.mxu1 %v2121_v9 }
 0x16e   :  { %2045 = vmatmul.mubr.msk.f32.vlgmr.msra.gmra.mxu0 %vm2711_vm4, %v2042_v51  ;;  %2056 = vmatprep.subr.msk.mxu1 %vm2356_vm13, %v1092_v55  ;;  %v1437_v57 = vpop.permute.xlu1 %1436  ;;  %v1439_v58 = vpop.permute.xlu0 %1438  ;;  %vm221_vm4 = vcmp.le.s32.totalorder %v2311_v56, 14  ;;  %v2073_v56 = vld [vmem:[%s2665_s3 + $0x40] sm:$0xff] }
 0x16f   :  { %965 = vmatpush1.msra.mxu0 %v2232_v18  ;;  %v1089_v18 = vsel %vm1088_vm15, %v1085_v41, %v1087_v42  ;;  %998 = vmatprep.mubr.f32.mxu0 %v2121_v9  ;;  %vm1269_vm15 = vmand %vm221_vm4, %vm2716_vm1 }
 0x170   :  { %2053 = vmatprep.subr.msk.mxu0 %vm2373_vm0, %v1090_v24  ;;  %2051 = vmatmul.mubr.msk.f32.vlgmr.msra.gmra.mxu1 %vm2720_vm9, %v2049_v23 }
 0x171   :  { %2057 = vmatpush1.msk.msra.mxu1 %vm2405_vm10, %v1089_v18  ;;  %1245 = vmatprep.mubr.f32.mxu1 %v2121_v9 }
 0x172   :  { %2050 = vmatmul.mubr.msk.f32.vlgmr.msra.gmra.mxu0 %vm2720_vm9, %v2049_v23  ;;  %2063 = vmatprep.subr.msk.mxu1 %vm2533_vm6, %v1268_v60  ;;  %vm1444_vm9 = vcmp.lt.s32.totalorder %v2281_v29, 112  ;;  %vm2721_vm6 = vcmask 64512   ;;  %v1441_v62 = vpop.permute.xlu1 %1440  ;;  %v1443_v11 = vpop.permute.xlu0 %1442 }
 0x173   :  { %2054 = vmatpush1.msk.msra.mxu0 %vm2425_vm11, %v1091_v59  ;;  %1174 = vmatprep.mubr.f32.mxu0 %v2121_v9  ;;  %v1446_v8 = vsel %vm1444_vm9, %v1439_v58, %v1441_v62  ;;  %vm2722_vm7 = vmmov %vm2721_vm6  ;;  %v1448_v13 = vsel %vm1444_vm9, %v1443_v11, %v1437_v57  ;;  %v1445_v16 = vsel %vm1444_vm9, %v1441_v62, %v1443_v11 }
 0x174   :  { %2060 = vmatprep.subr.msk.mxu0 %vm1270_vm3, %v1266_v63  ;;  %2058 = vmatmul.mubr.msk.f32.vlgmr.msra.gmra.mxu1 %vm2721_vm6, %v2052_v61  ;;  %vm2723_vm1 = vmmov %vm2721_vm6  ;;  %v1447_v22 = vsel %vm1444_vm9, %v1437_v57, %v1439_v58 }
 0x175   :  { %2064 = vmatpush1.msk.msra.mxu1 %vm1271_vm5, %v1265_v10  ;;  %1425 = vmatprep.mubr.f32.mxu1 %v2121_v9  ;;  %vm2724_vm14 = vmmov %vm2723_vm1  ;;  %vm1620_vm5 = vcmp.lt.s32.totalorder %v2281_v29, 111 }
 0x176   :  { %2055 = vmatmul.mubr.msk.f32.vlgmr.msra.gmra.mxu0 %vm2722_vm7, %v2052_v61  ;;  %2070 = vmatprep.subr.msk.mxu1 %vm224_vm2, %v1448_v13  ;;  %v1613_v17 = vpop.permute.xlu1 %1612  ;;  %v1615_v21 = vpop.permute.xlu0 %1614  ;;  %vm1626_vm3 = vmand %vm222_vm8, %vm2373_vm0 }
 0x177   :  { %2061 = vmatpush1.msk.msra.mxu0 %vm1269_vm15, %v1267_v12  ;;  %1354 = vmatprep.mubr.f32.mxu0 %v2121_v9  ;;  %vm1628_vm15 = vmand %vm224_vm2, %vm2356_vm13  ;;  %v1623_v32 = vsel %vm1620_vm5, %v1613_v17, %v1615_v21 }
 0x178   :  { %2067 = vmatprep.subr.msk.mxu0 %vm222_vm8, %v1446_v8  ;;  %2065 = vmatmul.mubr.msk.f32.vlgmr.msra.gmra.mxu1 %vm2723_vm1, %v2059_v15  ;;  %vm2725_vm9 = vmmov %vm2723_vm1 }
 0x179   :  { %2071 = vmatpush1.msk.msra.mxu1 %vm223_vm12, %v1445_v16  ;;  %1601 = vmatprep.mubr.f32.mxu1 %v2121_v9  ;;  %vm1625_vm6 = vmand %vm221_vm4, %vm2425_vm11 }
 0x17a   :  { %2062 = vmatmul.mubr.msk.f32.vlgmr.msra.gmra.mxu0 %vm2724_vm14, %v2059_v15  ;;  %v1617_v26 = vpop.permute.xlu1 %1616  ;;  %v1619_v28 = vpop.permute.xlu0 %1618  ;;  %vm2726_vm0 = vmmov %vm2723_vm1 }
 0x17b   :  { %2068 = vmatpush1.msk.msra.mxu0 %vm221_vm4, %v1447_v22  ;;  %1530 = vmatprep.mubr.f32.mxu0 %v2121_v9  ;;  %v1622_v52 = vsel %vm1620_vm5, %v1615_v21, %v1617_v26  ;;  %v1621_v29 = vsel %vm1620_vm5, %v1617_v26, %v1619_v28  ;;  %v1624_v20 = vsel %vm1620_vm5, %v1619_v28, %v1613_v17  ;;  %vm1627_vm8 = vmand %vm223_vm12, %vm2405_vm10 }
 0x17c   :  { %2072 = vmatmul.mubr.msk.f32.vlgmr.msra.gmra.mxu1 %vm2725_vm9, %v2066_v25  ;;  %2074 = vmatprep.subr.msk.mxu0 %vm1626_vm3, %v1622_v52  ;;  %vm2727_vm11 = vmmov %vm2726_vm0 }
 0x17d   :  { %1781 = vmatprep.mubr.f32.mxu1 %v2121_v9  ;;  %2077 = vmatprep.subr.msk.mxu1 %vm1628_vm15, %v1624_v20  ;;  %vm2728_vm13 = vmmov %vm2726_vm0 }
 0x17e   :  { %2069 = vmatmul.mubr.msk.f32.vlgmr.msra.gmra.mxu0 %vm2726_vm0, %v2066_v25  ;;  %2078 = vmatpush1.msk.msra.mxu1 %vm1627_vm8, %v1621_v29  ;;  %vm2729_vm10 = vmmov %vm2726_vm0 }
 0x17f   :  { %2075 = vmatpush1.msk.msra.mxu0 %vm1625_vm6, %v1623_v32  ;;  %1710 = vmatprep.mubr.f32.mxu0 %v2121_v9  ;;  %vm2730_vm2 = vmmov %vm2726_vm0 }
 0x180   :  { %2079 = vmatmul.mubr.msk.f32.vlgmr.msra.gmra.mxu1 %vm2728_vm13, %v2073_v56  ;;  %vm2731_vm12 = vmmov %vm2726_vm0 }
 0x181   :  { %1967 = vmatprep.mubr.f32.mxu1 %v2121_v9  ;;  %vm2732_vm4 = vmmov %vm2726_vm0 }
 0x182   :  { %2076 = vmatmul.mubr.msk.f32.vlgmr.msra.gmra.mxu0 %vm2727_vm11, %v2073_v56 }
 0x183   :  { %1890 = vmatprep.mubr.f32.mxu0 %v2121_v9 }
 0x21d   :  { %v423_v54 = vpop.f32.mrf.mxu1 }
 0x21f   :  { %v352_v14 = vpop.f32.mrf.mxu0  ;;  %v425_v27 = vpop.f32.mrf.mxu1 }
 0x221   :  { %v354_v30 = vpop.f32.mrf.mxu0 }
 0x222   :  { %v568_v31 = vpop.f32.mrf.mxu1 }
 0x223   :  { %v569_v48 = vadd.f32 %v568_v31, %v423_v54 }
 0x224   :  { %v570_v34 = vpop.f32.mrf.mxu1 }
 0x225   :  { %v571_v53 = vadd.f32 %v570_v34, %v425_v27 }
 0x226   :  { %v497_v33 = vpop.f32.mrf.mxu0 }
 0x227   :  { %v498_v50 = vadd.f32 %v497_v33, %v352_v14 }
 0x228   :  { %v499_v36 = vpop.f32.mrf.mxu0  ;;  %v744_v37 = vpop.f32.mrf.mxu1 }
 0x229   :  { %v500_v55 = vadd.f32 %v499_v36, %v354_v30  ;;  %v751_v23 = vadd.f32 %v744_v37, %v569_v48 }
 0x22a   :  { %v673_v38 = vpop.f32.mrf.mxu0  ;;  %v746_v35 = vpop.f32.mrf.mxu1 }
 0x22b   :  { %v749_v24 = vadd.f32 %v673_v38, %v498_v50  ;;  %v752_v57 = vadd.f32 %v746_v35, %v571_v53  ;;  %v1813_v53 = vpop.permute.xlu0 %1812 }
 0x22c   :  { %v675_v39 = vpop.f32.mrf.mxu0  ;;  %v920_v41 = vpop.f32.mrf.mxu1 }
 0x22d   :  { %v750_v58 = vadd.f32 %v675_v39, %v500_v55  ;;  %v927_v59 = vadd.f32 %v920_v41, %v751_v23  ;;  %v1796_v39 = vpop.permute.xlu1 %1795 }
 0x22e   :  { %v849_v42 = vpop.f32.mrf.mxu0  ;;  %v922_v43 = vpop.f32.mrf.mxu1 }
 0x22f   :  { %v925_v60 = vadd.f32 %v849_v42, %v749_v24  ;;  %v928_v10 = vadd.f32 %v922_v43, %v752_v57 }
 0x230   :  { %v851_v46 = vpop.f32.mrf.mxu0  ;;  %v1071_v44 = vpop.f32.mrf.mxu1 }
 0x231   :  { %v926_v62 = vadd.f32 %v851_v46, %v750_v58  ;;  %v1078_v11 = vadd.f32 %v1071_v44, %v927_v59 }
 0x232   :  { %v1000_v45 = vpop.f32.mrf.mxu0  ;;  %v1073_v40 = vpop.f32.mrf.mxu1 }
 0x233   :  { %v1076_v12 = vadd.f32 %v1000_v45, %v925_v60  ;;  %v1079_v15 = vadd.f32 %v1073_v40, %v928_v10  ;;  %v1818_v10 = vpop.permute.xlu1 %1817 }
 0x234   :  { %v1002_v47 = vpop.f32.mrf.mxu0  ;;  %v1247_v51 = vpop.f32.mrf.mxu1 }
 0x235   :  { %v1077_v16 = vadd.f32 %v1002_v47, %v926_v62  ;;  %v1254_v17 = vadd.f32 %v1247_v51, %v1078_v11  ;;  %v1806_v51 = vld [vmem:[%s2667_s5] sm:$0xff] }
 0x236   :  { %v1176_v49 = vpop.f32.mrf.mxu0  ;;  %v1249_v19 = vpop.f32.mrf.mxu1 }
 0x237   :  { %v1252_v21 = vadd.f32 %v1176_v49, %v1076_v12  ;;  %v1255_v26 = vadd.f32 %v1249_v19, %v1079_v15  ;;  %v1807_v49 = vld [vmem:[%s2667_s5 + $0x8] sm:$0xff]  ;;  %s2131_s5 = smov [#allocation2]  }
 0x238   :  { %v1178_v18 = vpop.f32.mrf.mxu0  ;;  %v1427_v61 = vpop.f32.mrf.mxu1  ;;  %s2009_s25 = sshll.u32 %s2131_s5, 4  ;;  %s2010_s25 = int_to_ptr.vmem [resolvable:$true] %s2009_s25 }
 0x239   :  { %v1253_v28 = vadd.f32 %v1178_v18, %v1077_v16  ;;  %v1434_v52 = vadd.f32 %v1427_v61, %v1254_v17  ;;  %s2099_s26 = scalar_lea.vmem %s2010_s25, 1024  ;;  %p2104_p1 = scmp.lt.s32.totalorder %s2010_s25, %s2010_s25 }
 0x23a   :  { %v1356_v63 = vpop.f32.mrf.mxu0  ;;  %v1429_v8 = vpop.f32.mrf.mxu1  ;;  %p2100_p0 = scmp.ne.s32.totalorder %s2010_s25, %s2099_s26  ;;  %p2105_p2 = scmp.lt.s32.totalorder %s2099_s26, %s2099_s26 }
 0x23b   :  { %v1432_v29 = vadd.f32 %v1356_v63, %v1252_v21  ;;  %v1435_v56 = vadd.f32 %v1429_v8, %v1255_v26 }
 0x23c   :  { %v1358_v13 = vpop.f32.mrf.mxu0  ;;  %v1603_v22 = vpop.f32.mrf.mxu1  ;;  %p2106_p3 = por %p2105_p2, %p2104_p1 }
 0x23d   :  { %v1433_v54 = vadd.f32 %v1358_v13, %v1253_v28  ;;  %v1610_v14 = vadd.f32 %v1603_v22, %v1434_v52 }
 0x23e   :  { %v1532_v25 = vpop.f32.mrf.mxu0  ;;  %v1605_v20 = vpop.f32.mrf.mxu1  ;;  %p2107_p4 = pnand %p2106_p3, %p2100_p0 }
 0x23f   :  { %v1608_v27 = vadd.f32 %v1532_v25, %v1432_v29  ;;  %v1611_v33 = vadd.f32 %v1605_v20, %v1435_v56 }
 0x240   :  { %v1534_v32 = vpop.f32.mrf.mxu0  ;;  %v1783_v31 = vpop.f32.mrf.mxu1 }
 0x241   :  { %v1609_v34 = vadd.f32 %v1534_v32, %v1433_v54  ;;  %v1790_v37 = vadd.f32 %v1783_v31, %v1610_v14 }
 0x242   :  { %v1712_v30 = vpop.f32.mrf.mxu0  ;;  %v1785_v35 = vpop.f32.mrf.mxu1 }
 0x243   :  { %v1788_v36 = vadd.f32 %v1712_v30, %v1608_v27  ;;  %v1791_v42 = vadd.f32 %v1785_v35, %v1611_v33  ;;  %v1800_v46 = vadd.f32 %v1796_v39, %v1790_v37 }
 0x244   :  { %v1714_v38 = vpop.f32.mrf.mxu0 }
 0x245   :  { %v1789_v41 = vadd.f32 %v1714_v38, %v1609_v34  ;;  %v1798_v43 = vadd.f32 %v1796_v39, %v1788_v36  ;;  %v1801_v45 = vadd.f32 %v1796_v39, %v1791_v42  ;;  %v1804_v50 = vmax.f32 %v1800_v46, 0.0 }
 0x247   :  { %v1799_v44 = vadd.f32 %v1796_v39, %v1789_v41  ;;  %v1805_v47 = vmax.f32 %v1801_v45, 0.0  ;;  %v1802_v48 = vmax.f32 %v1798_v43, 0.0 }
 0x249   :  { %v1803_v40 = vmax.f32 %v1799_v44, 0.0  ;;  %1933 = vmatprep.subr.mxu1 %v1805_v47 }
 0x24a   :  { %1934 = vmatpush1.msra.mxu1 %v1804_v50 }
 0x24b   :  { %1856 = vmatprep.subr.mxu0 %v1803_v40  ;;  %2082 = vmatmul.mubr.msk.f32.vlgmr.msra.gmra.mxu1 %vm2730_vm2, %v1806_v51 }
 0x24c   :  { %1857 = vmatpush1.msra.mxu0 %v1802_v48  ;;  %1973 = vmatprep.mubr.f32.mxu1 %v2121_v9 }
 0x24d   :  { %2080 = vmatmul.mubr.msk.f32.vlgmr.msra.gmra.mxu0 %vm2729_vm10, %v1806_v51 }
 0x24e   :  { %1896 = vmatprep.mubr.f32.mxu0 %v2121_v9 }
 0x24f   :  { %2083 = vmatmul.mubr.msk.f32.gmra.mxu1 %vm2732_vm4, %v1807_v49 }
 0x251   :  { %2081 = vmatmul.mubr.msk.f32.gmra.mxu0 %vm2731_vm12, %v1807_v49 }
 0x30b   :  { %v1969_v23 = vpop.f32.mrf.mxu1 }
 0x30c   :  { %v1970_v19 = vadd.f32 %v1969_v23, %v1813_v53 }
 0x30d   :  { %v1892_v55 = vpop.f32.mrf.mxu0  ;;  %v1971_v57 = vpop.f32.mrf.mxu1 }
 0x30e   :  { %v1893_v24 = vadd.f32 %v1892_v55, %v1813_v53  ;;  %v1982_v59 = vadd.f32 %v1970_v19, %v2216_v7  ;;  %v1972_v60 = vadd.f32 %v1971_v57, %v1813_v53 }
 0x30f   :  { %v1894_v18 = vpop.f32.mrf.mxu0  ;;  %v1975_v63 = vpop.f32.mrf.mxu1 }
 0x310   :  { %v1980_v58 = vadd.f32 %v1893_v24, %v2211_v6  ;;  %v1895_v9 = vadd.f32 %v1894_v18, %v1813_v53  ;;  %v1990_v11 = vmax.f32 %v1982_v59, 0.0  ;;  %v1983_v8 = vadd.f32 %v1972_v60, %v2204_v5 }
 0x311   :  { %v1898_v61 = vpop.f32.mrf.mxu0  ;;  %v1976_v15 = vadd.f32 %v1975_v63, %v1818_v10  ;;  %v1977_v17 = vpop.f32.mrf.mxu1 }
 0x312   :  { %v1988_v62 = vmax.f32 %v1980_v58, 0.0  ;;  %v1981_v12 = vadd.f32 %v1895_v9, %v2199_v4  ;;  %v1899_v13 = vadd.f32 %v1898_v61, %v1818_v10  ;;  %1998 = vst [vmem:[#allocation2 + $0x10] sm:$0xff] %v1990_v11  ;;  %v1991_v21 = vmax.f32 %v1983_v8, 0.0 }
 0x313   :  { %v1900_v16 = vpop.f32.mrf.mxu0  ;;  %v1978_v22 = vadd.f32 %v1977_v17, %v1818_v10  ;;  %v1986_v26 = vadd.f32 %v1976_v15, %v2194_v3 }
 0x314   :  { %1996 = vst [vmem:[#allocation2] sm:$0xff] %v1988_v62  ;;  %v1989_v6 = vmax.f32 %v1981_v12, 0.0  ;;  %v1901_v7 = vadd.f32 %v1900_v16, %v1818_v10  ;;  %v1984_v25 = vadd.f32 %v1899_v13, %v2187_v2  ;;  %1999 = vst [vmem:[#allocation2 + $0x18] sm:$0xff] %v1991_v21 }
 0x315   :  { %v1987_v5 = vadd.f32 %v1978_v22, %v2182_v1  ;;  %v1994_v52 = vmax.f32 %v1986_v26, 0.0 }
 0x316   :  { %1997 = vst [vmem:[#allocation2 + $0x8] sm:$0xff] %v1989_v6  ;;  %v1985_v4 = vadd.f32 %v1901_v7, %v2177_v0  ;;  %v1992_v28 = vmax.f32 %v1984_v25, 0.0 }
 0x317   :  { %v1995_v20 = vmax.f32 %v1987_v5, 0.0  ;;  %2002 = vst [vmem:[#allocation2 + $0x30] sm:$0xff] %v1994_v52 }
 0x318   :  { %v1993_v29 = vmax.f32 %v1985_v4, 0.0  ;;  %2000 = vst [vmem:[#allocation2 + $0x20] sm:$0xff] %v1992_v28 }
 0x319   :  { %2003 = vst [vmem:[#allocation2 + $0x38] sm:$0xff] %v1995_v20 }
 0x31a   :  { %2001 = vst [vmem:[#allocation2 + $0x28] sm:$0xff] %v1993_v29 }
 0x31b   :  { %2110 = shalt.err (!%p2107_p4)
}
 0x31c   :  { %s2132_s27 = smov 512   ;;  %s2133_s28 = smov 32  }
 0x31d   :  { %2015 = dma.vmem_to_hbm [thread:$0]  %s2010_s25, 1024, %s2669_s7, [#allocation3], %s2132_s27, %s2132_s27, %s2133_s28  }
 0x31e   :  { %2119 = dma.done.wait [#allocation3], 1024  }
 0x31f   :  { %2120 = vsyncadd [#allocation3], 4294966272 }
 0x320   :  { %2019 = vsyncpa [#allocation3], 1 }

</bundles_post_ra>
